<compile_context>
chip_gen: v7x
topology: tpu7x:2x2x1
jax: 0.10.0
libtpu: 0.0.40
codegen_flags: <defaults>
</compile_context>

<pallas_src>
import jax
import jax.numpy as jnp
from jax.experimental import pallas as pl
from jax.experimental.pallas import tpu as pltpu


def _make_eca_kernel(g, hw):
    """Build the kernel for blocks of shape (Nb, C/g, g*hw); g and hw are static."""

    def kernel(w_ref, x_ref, o_ref):
        # w_ref: SMEM (3,) f32 conv weights.  x_ref / o_ref: VMEM (Nb, Cg, g*hw).
        nb, n_cg, _ = x_ref.shape
        c_total = n_cg * g
        inv_hw = jnp.float32(1.0 / hw)

        # --- Global average pool per true channel c = cg*g + j ------------------
        # Re-read lane slices of the ref (no full-block value kept live); accumulate
        # the reduction in f32 without materializing a full-block f32 copy.
        ys = []
        for j in range(g):
            xs = x_ref[:, :, j * hw:(j + 1) * hw]
            ys.append(jnp.sum(xs, axis=-1, dtype=jnp.float32) * inv_hw)  # (Nb, Cg)

        # --- k=3, pad=1 conv over the channel axis + sigmoid ---------------------
        # Neighbours of channel c = cg*g + j live either in the adjacent group (same
        # row) or in the adjacent row's boundary group; realised with non-negative
        # pltpu.roll shifts plus zero masks at c=0 / c=C-1 (zero padding).
        w0, w1, w2 = w_ref[0], w_ref[1], w_ref[2]
        cg_idx = jax.lax.broadcasted_iota(jnp.int32, (nb, n_cg), 1)
        scales = []
        for j in range(g):
            c_idx = cg_idx * g + j                              # true channel index
            if j >= 1:
                y_m1 = ys[j - 1]                                # y[c-1], same row
            else:
                y_m1 = pltpu.roll(ys[g - 1], 1 % n_cg, 1)       # y[c-1] = y[cg-1, g-1]
            y_m1 = jnp.where(c_idx >= 1, y_m1, 0.0)
            if j <= g - 2:
                y_p1 = ys[j + 1]                                # y[c+1], same row
            else:
                y_p1 = pltpu.roll(ys[0], n_cg - 1, 1)           # y[c+1] = y[cg+1, 0]
            y_p1 = jnp.where(c_idx <= c_total - 2, y_p1, 0.0)
            z = w0 * y_m1 + w1 * ys[j] + w2 * y_p1              # (Nb, Cg) f32
            scales.append(jax.nn.sigmoid(z).astype(o_ref.dtype))  # single cast

        # --- Scale and write back, one lane-slice per channel group --------------
        for j in range(g):
            xs = x_ref[:, :, j * hw:(j + 1) * hw]
            o_ref[:, :, j * hw:(j + 1) * hw] = xs * scales[j][:, :, None]

    return kernel


def _pick_channel_fold(C, HW, max_g=8):
    """Smallest g dividing C with (g*HW) % 128 == 0 (lane-dense blocks); 1 if none."""
    if HW % 128 == 0:
        return 1
    for g in range(2, max_g + 1):
        if C % g == 0 and (g * HW) % 128 == 0:
            return g
    return 1


def _largest_divisor_leq(n, cap):
    cap = max(1, min(n, cap))
    for d in range(cap, 0, -1):
        if n % d == 0:
            return d
    return 1


def _vmem_budget():
    """(vmem_limit_bytes, target_block_bytes) sized per TPU generation."""
    try:
        cap = int(pltpu.get_tpu_info().vmem_capacity_bytes)
    except Exception:
        cap = 64 * 1024 * 1024            # conservative fallback (v7x per-TC VMEM)
    # Scoped limit: 3/4 of physical, capped at 96 MiB (-> 96 MiB on v5e/v6e, 48 on v7x).
    vmem_limit = max(32 * 1024 * 1024, min((cap * 3) // 4, 96 * 1024 * 1024))
    # Live VMEM ~= 2 buffers x (in block + out block) = 4x block bytes (+ small temps),
    # so keep the block at ~1/6 of the scoped limit.
    target_block_bytes = vmem_limit // 6
    return vmem_limit, target_block_bytes


def eca_forward(x, conv_w):
    """x: (T, B, C, H, W); conv_w: 3-element Conv1d(1,1,3,bias=False) weight."""
    T, B, C, H, W = x.shape
    N, HW = T * B, H * W

    g = _pick_channel_fold(C, HW)
    n_cg, L = C // g, g * HW
    x2 = x.reshape(N, n_cg, L)            # free view: channels are contiguous with HW

    itemsize = jnp.dtype(x.dtype).itemsize
    slab_bytes = n_cg * L * itemsize
    vmem_limit, target_block_bytes = _vmem_budget()

    # Slab batch Nb: as large as the VMEM budget allows, but keep >= 8 grid steps
    # (when N permits) so DMA stays double-buffered and v7x's 2 TCs both get work.
    MIN_STEPS = 8
    nb_bytes_cap = max(1, target_block_bytes // max(1, slab_bytes))
    nb_cap = min(nb_bytes_cap, max(1, N // MIN_STEPS))
    Nb = _largest_divisor_leq(N, nb_cap)
    grid = (N // Nb,)

    w = jnp.asarray(conv_w, jnp.float32).reshape(3)

    out2 = pl.pallas_call(
        _make_eca_kernel(g, HW),
        out_shape=jax.ShapeDtypeStruct((N, n_cg, L), x.dtype),
        grid_spec=pltpu.PrefetchScalarGridSpec(
            num_scalar_prefetch=0,
            grid=grid,
            in_specs=[
                pl.BlockSpec(memory_space=pltpu.MemorySpace.SMEM),   # conv_w (3,)
                pl.BlockSpec((Nb, n_cg, L), lambda n: (n, 0, 0)),    # x block
            ],
            out_specs=pl.BlockSpec((Nb, n_cg, L), lambda n: (n, 0, 0)),
        ),
        compiler_params=pltpu.CompilerParams(
            dimension_semantics=("parallel",),   # independent slabs (megacore-shardable)
            vmem_limit_bytes=vmem_limit,
        ),
    )(w, x2)

    return out2.reshape(T, B, C, H, W)


def _reference(x, conv_w):
    # Pure-JAX reference for validation.
    y = jnp.mean(x, axis=(-2, -1))                                # (T, B, C)
    yp = jnp.pad(y, ((0, 0), (0, 0), (1, 1)))
    z = (conv_w[0] * yp[..., :-2] + conv_w[1] * yp[..., 1:-1]
         + conv_w[2] * yp[..., 2:])                               # (T, B, C)
    s = jax.nn.sigmoid(z)[..., None, None]
    return x * s


if __name__ == "__main__":
    key = jax.random.PRNGKey(0)
    kx, kw = jax.random.split(key)

    # Deterministic Conv1d(1, 1, 3, bias=False) weight (uniform in +/- 1/sqrt(fan_in=3)).
    bound = 1.0 / jnp.sqrt(3.0)
    conv_w = jax.random.uniform(kw, (3,), minval=-bound, maxval=bound,
                                dtype=jnp.float32)

    # Config 1: HW = 64 (not a multiple of 128) -> channel fold g = 2 gives 128 lanes.
    T, B, C, H, W = 2, 2, 16, 8, 8
    x = jax.random.normal(kx, (T, B, C, H, W), dtype=jnp.float32)
    out = jax.block_until_ready(eca_forward(x, conv_w))
    ref = _reference(x, conv_w)
    assert out.shape == x.shape
    assert jnp.allclose(out, ref, atol=1e-5, rtol=1e-5)

    # Config 2: HW = 256 (already lane-dense) -> g = 1 fallback path.
    x_b = jax.random.normal(jax.random.PRNGKey(1), (1, 2, 8, 16, 16), dtype=jnp.float32)
    out_b = jax.block_until_ready(eca_forward(x_b, conv_w))
    ref_b = _reference(x_b, conv_w)
    assert out_b.shape == x_b.shape
    assert jnp.allclose(out_b, ref_b, atol=1e-5, rtol=1e-5)

    print("KERNEL_OK")
</pallas_src>

<mosaic_0001>
module attributes {stable_mosaic.version = 11 : i64} {
  func.func @kernel(%arg0: i32, %arg1: memref<3xf32, #tpu.memory_space<smem>>, %arg2: memref<1x8x128xf32, #tpu.memory_space<vmem>>, %arg3: memref<1x8x128xf32, #tpu.memory_space<vmem>>) attributes {dimension_semantics = [#tpu.dimension_semantics<parallel>], iteration_bounds = array<i64: 4>, scalar_prefetch = 0 : i64, scratch_operands = 0 : i64, tpu.core_type = #tpu.core_type<tc>, window_params = [{transform_indices = @transform_0, window_bounds = array<i64: 3>}, {transform_indices = @transform_1, window_bounds = array<i64: 1, 8, 128>}, {transform_indices = @transform_2, window_bounds = array<i64: 1, 8, 128>}]} {
    %c0 = arith.constant 0 : index
    %c0_0 = arith.constant 0 : index
    %c0_1 = arith.constant 0 : index
    %0 = vector.load %arg2[%c0, %c0_0, %c0_1] : memref<1x8x128xf32, #tpu.memory_space<vmem>>, vector<1x8x64xf32>
    %cst = arith.constant dense<0.000000e+00> : vector<1x8xf32>
    %1 = vector.multi_reduction <add>, %0, %cst [2] : vector<1x8x64xf32> to vector<1x8xf32>
    %cst_2 = arith.constant 1.562500e-02 : f32
    %2 = vector.broadcast %cst_2 : f32 to vector<1x8xf32>
    %3 = arith.mulf %1, %2 : vector<1x8xf32>
    %c0_3 = arith.constant 0 : index
    %c0_4 = arith.constant 0 : index
    %c64 = arith.constant 64 : index
    %4 = vector.load %arg2[%c0_3, %c0_4, %c64] : memref<1x8x128xf32, #tpu.memory_space<vmem>>, vector<1x8x64xf32>
    %cst_5 = arith.constant dense<0.000000e+00> : vector<1x8xf32>
    %5 = vector.multi_reduction <add>, %4, %cst_5 [2] : vector<1x8x64xf32> to vector<1x8xf32>
    %cst_6 = arith.constant 1.562500e-02 : f32
    %6 = vector.broadcast %cst_6 : f32 to vector<1x8xf32>
    %7 = arith.mulf %5, %6 : vector<1x8xf32>
    %c0_7 = arith.constant 0 : index
    %8 = memref.load %arg1[%c0_7] : memref<3xf32, #tpu.memory_space<smem>>
    %c1 = arith.constant 1 : index
    %9 = memref.load %arg1[%c1] : memref<3xf32, #tpu.memory_space<smem>>
    %c2 = arith.constant 2 : index
    %10 = memref.load %arg1[%c2] : memref<3xf32, #tpu.memory_space<smem>>
    %11 = tpu.iota {dimensions = array<i32: 1>} : vector<1x8xi32>
    %c2_i32 = arith.constant 2 : i32
    %12 = vector.broadcast %c2_i32 : i32 to vector<1x8xi32>
    %13 = arith.muli %11, %12 : vector<1x8xi32>
    %c0_i32 = arith.constant 0 : i32
    %14 = vector.broadcast %c0_i32 : i32 to vector<1x8xi32>
    %15 = arith.addi %13, %14 : vector<1x8xi32>
    %c1_i32 = arith.constant 1 : i32
    %16 = tpu.dynamic_rotate %7 by %c1_i32 dim 1 : vector<1x8xf32>, i32 -> vector<1x8xf32>
    %c1_i32_8 = arith.constant 1 : i32
    %17 = vector.broadcast %c1_i32_8 : i32 to vector<1x8xi32>
    %18 = arith.cmpi sge, %15, %17 : vector<1x8xi32>
    %cst_9 = arith.constant 0.000000e+00 : f32
    %19 = vector.broadcast %cst_9 : f32 to vector<1x8xf32>
    %20 = arith.select %18, %16, %19 : vector<1x8xi1>, vector<1x8xf32>
    %c14_i32 = arith.constant 14 : i32
    %21 = vector.broadcast %c14_i32 : i32 to vector<1x8xi32>
    %22 = arith.cmpi sle, %15, %21 : vector<1x8xi32>
    %cst_10 = arith.constant 0.000000e+00 : f32
    %23 = vector.broadcast %cst_10 : f32 to vector<1x8xf32>
    %24 = arith.select %22, %7, %23 : vector<1x8xi1>, vector<1x8xf32>
    %25 = vector.broadcast %8 : f32 to vector<1x8xf32>
    %26 = arith.mulf %25, %20 : vector<1x8xf32>
    %27 = vector.broadcast %9 : f32 to vector<1x8xf32>
    %28 = arith.mulf %27, %3 : vector<1x8xf32>
    %29 = arith.addf %26, %28 : vector<1x8xf32>
    %30 = vector.broadcast %10 : f32 to vector<1x8xf32>
    %31 = arith.mulf %30, %24 : vector<1x8xf32>
    %32 = arith.addf %29, %31 : vector<1x8xf32>
    %33 = arith.negf %32 : vector<1x8xf32>
    %34 = math.exp %33 : vector<1x8xf32>
    %cst_11 = arith.constant 1.000000e+00 : f32
    %35 = vector.broadcast %cst_11 : f32 to vector<1x8xf32>
    %36 = arith.addf %35, %34 : vector<1x8xf32>
    %37 = arith.divf %35, %36 : vector<1x8xf32>
    %c2_i32_12 = arith.constant 2 : i32
    %38 = vector.broadcast %c2_i32_12 : i32 to vector<1x8xi32>
    %39 = arith.muli %11, %38 : vector<1x8xi32>
    %c1_i32_13 = arith.constant 1 : i32
    %40 = vector.broadcast %c1_i32_13 : i32 to vector<1x8xi32>
    %41 = arith.addi %39, %40 : vector<1x8xi32>
    %c1_i32_14 = arith.constant 1 : i32
    %42 = vector.broadcast %c1_i32_14 : i32 to vector<1x8xi32>
    %43 = arith.cmpi sge, %41, %42 : vector<1x8xi32>
    %cst_15 = arith.constant 0.000000e+00 : f32
    %44 = vector.broadcast %cst_15 : f32 to vector<1x8xf32>
    %45 = arith.select %43, %3, %44 : vector<1x8xi1>, vector<1x8xf32>
    %c7_i32 = arith.constant 7 : i32
    %46 = tpu.dynamic_rotate %3 by %c7_i32 dim 1 : vector<1x8xf32>, i32 -> vector<1x8xf32>
    %c14_i32_16 = arith.constant 14 : i32
    %47 = vector.broadcast %c14_i32_16 : i32 to vector<1x8xi32>
    %48 = arith.cmpi sle, %41, %47 : vector<1x8xi32>
    %cst_17 = arith.constant 0.000000e+00 : f32
    %49 = vector.broadcast %cst_17 : f32 to vector<1x8xf32>
    %50 = arith.select %48, %46, %49 : vector<1x8xi1>, vector<1x8xf32>
    %51 = vector.broadcast %8 : f32 to vector<1x8xf32>
    %52 = arith.mulf %51, %45 : vector<1x8xf32>
    %53 = vector.broadcast %9 : f32 to vector<1x8xf32>
    %54 = arith.mulf %53, %7 : vector<1x8xf32>
    %55 = arith.addf %52, %54 : vector<1x8xf32>
    %56 = vector.broadcast %10 : f32 to vector<1x8xf32>
    %57 = arith.mulf %56, %50 : vector<1x8xf32>
    %58 = arith.addf %55, %57 : vector<1x8xf32>
    %59 = arith.negf %58 : vector<1x8xf32>
    %60 = math.exp %59 : vector<1x8xf32>
    %cst_18 = arith.constant 1.000000e+00 : f32
    %61 = vector.broadcast %cst_18 : f32 to vector<1x8xf32>
    %62 = arith.addf %61, %60 : vector<1x8xf32>
    %63 = arith.divf %61, %62 : vector<1x8xf32>
    %c0_19 = arith.constant 0 : index
    %c0_20 = arith.constant 0 : index
    %c0_21 = arith.constant 0 : index
    %64 = vector.load %arg2[%c0_19, %c0_20, %c0_21] : memref<1x8x128xf32, #tpu.memory_space<vmem>>, vector<1x8x64xf32>
    %65 = vector.shape_cast %37 : vector<1x8xf32> to vector<1x8x1xf32>
    %66 = vector.broadcast %65 : vector<1x8x1xf32> to vector<1x8x64xf32>
    %67 = arith.mulf %64, %66 : vector<1x8x64xf32>
    %c0_22 = arith.constant 0 : index
    %c0_23 = arith.constant 0 : index
    %c0_24 = arith.constant 0 : index
    %68 = vector.load %arg3[%c0_22, %c0_23, %c0_24] : memref<1x8x128xf32, #tpu.memory_space<vmem>>, vector<1x8x64xf32>
    tpu.vector_store %arg3[%c0_22, %c0_23, %c0_24], %67 {strides = array<i32>} : memref<1x8x128xf32, #tpu.memory_space<vmem>>, vector<1x8x64xf32>,
    %c0_25 = arith.constant 0 : index
    %c0_26 = arith.constant 0 : index
    %c64_27 = arith.constant 64 : index
    %69 = vector.load %arg2[%c0_25, %c0_26, %c64_27] : memref<1x8x128xf32, #tpu.memory_space<vmem>>, vector<1x8x64xf32>
    %70 = vector.shape_cast %63 : vector<1x8xf32> to vector<1x8x1xf32>
    %71 = vector.broadcast %70 : vector<1x8x1xf32> to vector<1x8x64xf32>
    %72 = arith.mulf %69, %71 : vector<1x8x64xf32>
    %c0_28 = arith.constant 0 : index
    %c0_29 = arith.constant 0 : index
    %c64_30 = arith.constant 64 : index
    %73 = vector.load %arg3[%c0_28, %c0_29, %c64_30] : memref<1x8x128xf32, #tpu.memory_space<vmem>>, vector<1x8x64xf32>
    tpu.vector_store %arg3[%c0_28, %c0_29, %c64_30], %72 {strides = array<i32>} : memref<1x8x128xf32, #tpu.memory_space<vmem>>, vector<1x8x64xf32>,
    return
  }
  func.func @transform_0(%arg0: i32) -> i32 {
    %c0_i32 = arith.constant 0 : i32
    %c0_i32_0 = arith.constant 0 : i32
    return %c0_i32 : i32
  }
  func.func @transform_1(%arg0: i32) -> (i32, i32, i32) {
    %c0_i32 = arith.constant 0 : i32
    %c0_i32_0 = arith.constant 0 : i32
    %c0_i32_1 = arith.constant 0 : i32
    return %arg0, %c0_i32, %c0_i32_0 : i32, i32, i32
  }
  func.func @transform_2(%arg0: i32) -> (i32, i32, i32) {
    %c0_i32 = arith.constant 0 : i32
    %c0_i32_0 = arith.constant 0 : i32
    %c0_i32_1 = arith.constant 0 : i32
    return %arg0, %c0_i32, %c0_i32_0 : i32, i32, i32
  }
}

</mosaic_0001>

<bundles_post_ra>
// kernel: tpu_custom_call.1
= control target key start
LH: loop header
LB: loop body
LE: loop exit
PB: predicated region body
PF: predicated region fallthrough
CT: control target
= control target key end

     0   :  { %7 = vsyncpa [#allocation5], 0  ;;  %s830_s0 = inlined_call_operand.hbm [shape: f32[3], index: 0, kind: input, shape index: {}]   ;;  %s831_s1 = inlined_call_operand.hbm [shape: f32[4,8,128], index: 1, kind: input, shape index: {}]   ;;  %s832_s2 = inlined_call_operand.hbm [shape: f32[4,8,128], index: 2, kind: output, shape index: {}]  }
   0x1   :  { %8 = vsyncpa [#allocation3], 0 }
   0x2   :  { %10 = vsyncpa [#allocation3 + $0x1], 0 }
   0x3   :  { %11 = vsyncpa [#allocation4], 0 }
   0x4   :  { %13 = vsyncpa [#allocation4 + $0x1], 0  ;;  %s610_s9 = smov 0   ;;  %s612_s10 = smov 0  }
   0x5   :  { %s614_s11 = smov 0   ;;  %s616_s12 = smov 0  }
   0x6 LB: > { %s631_s13 = sadd.s32 4294967295, %s586_s12   ;;  %s386_s14 = sadd.s32 4294967294, %s586_s12   ;;  %s586_s12 = sphi %s616_s12, %s852_s12   ;;  %s582_s11 = sphi %s614_s11, %s851_s11   ;;  %s578_s10 = sphi %s612_s10, %s850_s10   ;;  %s574_s9 = sphi %s610_s9, %s849_s9  }
   0x7   : > { %p60_p0 = scmp.ne.s32.totalorder %s578_s10, %s574_s9  ;;  %p833_p1 = scmp.eq.s32.totalorder %s631_s13, 0 }
   0x8   : > { %p90_p3 = scmp.eq.s32.totalorder %s386_s14, 3  ;;  %p387_p5 = scmp.ge.s32.totalorder %s586_s12, 1 }
   0x9   : > { %p640_p4 = por %p833_p1, %p60_p0  ;;  %p97_p7 = scmp.lt.s32.totalorder %s586_s12, 5 }
   0xa   : > { %p645_p6 = por %p90_p3, %p60_p0  ;;  %s655_s18 = sadd.s32 1, %s586_s12  }
   0xb   : > { %s836_s15 = scalar_select %p640_p4, 1, 0 }
   0xc   : > { %s837_s16 = scalar_select %p645_p6, 1, 0 }
   0xd   : > { %p650_p8 = pnand %p387_p5, %p97_p7  ;;  %s44_s19 = ssub.s32 %s586_s12, %s655_s18 }
   0xe   : > { %s47_s20 = sadd.s32 1, %s582_s11  ;;  %p668_p11 = scmp.eq.s32.totalorder %s44_s19, 0 }
   0xf   : > { %p412_p9 = pneg %p650_p8  ;;  %p54_p12 = scmp.ne.s32.totalorder %s582_s11, %s578_s10 }
  0x10   : > { %p55_p13 = scmp.eq.s32.totalorder %s586_s12, 0  ;;  %p425_p0 = scmp.lt.s32.totalorder %s586_s12, 4 }
  0x11   : > { %p664_p10 = pnand %p412_p9, %p833_p1  ;;  %s473_s25 = scalar_lea.hbm %s830_s0, 16 }
  0x12   : > { %p474_p3 = scmp.ne.s32.totalorder %s830_s0, %s473_s25  ;;  %p480_p1 = scmp.lt.u32.totalorder %s473_s25, %s830_s0 }
  0x13   : > { %p475_p5 = pneg %p664_p10 }
  0x15   : > { %p476_p7 = pnand %p475_p5, %p474_p3 }
  0x17   : > { %p477_p9 = pneg %p476_p7 }
  0x19   : > { %p482_p2 = pnand %p480_p1, %p477_p9 }
  0x1b   : > { %485 = shalt.err (!%p482_p2)
}
  0x1c   : > { %s588_s30 = smov [#allocation2]   ;;  %p56_p1 = por %p55_p13, %p54_p12 }
  0x1d   : > { %415 = dma.hbm_to_smem (!%p664_p10), %s830_s0, 16, %s588_s30, [#allocation5]  }
  0x1e   : > { %s695_s5 = scalar_select %p668_p11, %s582_s11, %s47_s20  }
  0x1f   : > { %p841_p2 = scmp.eq.s32.totalorder %s631_s13, 3  ;;  %s119_s7 = sand.u32 1, %s582_s11  }
  0x20   : > { %s391_s8 = sshll.u32 %s586_s12, 7  ;;  %s390_s14 = sshll.u32 %s119_s7, 3 }
  0x21   : > { %p707_p3 = por %p841_p2, %p54_p12  ;;  %s716_s23 = scalar_lea.hbm %s831_s1, %s391_s8 }
  0x22   : > { %s123_s20 = scalar_lea.vmem [#allocation6], %s390_s14  ;;  %p720_p10 = pnand %p425_p0, %p56_p1 }
  0x23   : > { %s842_s6 = scalar_select %p707_p3, 1, 0 }
  0x24   : > { %s130_s22 = sshll.u32 %s123_s20, 4  ;;  %s120_s25 = scalar_lea.sflag [#allocation3], %s119_s7  ;;  %s724_s22 = int_to_ptr.vmem [resolvable:$true] %s130_s22 }
  0x25   : > { %s486_s26 = scalar_lea.hbm %s716_s23, 128  ;;  %p488_p12 = pneg %p720_p10 }
  0x26   : > { %p487_p11 = scmp.ne.s32.totalorder %s716_s23, %s486_s26  ;;  %s491_s29 = scalar_lea.hbm %s831_s1, 512 }
  0x27   : > { %p492_p0 = scmp.lt.u32.totalorder %s716_s23, %s831_s1  ;;  %p493_p7 = scmp.lt.u32.totalorder %s491_s29, %s486_s26 }
  0x28   : > { %p489_p13 = pnand %p488_p12, %p487_p11  ;;  %p495_p1 = scmp.lt.u32.totalorder %s486_s26, %s716_s23 }
  0x29   : > { %p494_p9 = por %p493_p7, %p492_p0 }
  0x2a   : > { %p490_p5 = pneg %p489_p13 }
  0x2b   : > { %p496_p2 = por %p495_p1, %p494_p9 }
  0x2d   : > { %p497_p6 = pnand %p496_p2, %p490_p5 }
  0x2f   : > { %500 = shalt.err (!%p497_p6)
}
  0x30   : > { %s501_s4 = scalar_lea.vmem %s724_s22, 128  ;;  %s589_s7 = smov [#allocation6]  }
  0x31   : > { %p502_p11 = scmp.ne.s32.totalorder %s724_s22, %s501_s4  ;;  %s506_s8 = sshll.u32 %s589_s7, 4  ;;  %s507_s8 = int_to_ptr.vmem [resolvable:$false] %s506_s8 }
  0x32   : > { %s508_s14 = scalar_lea.vmem %s507_s8, 256  ;;  %p509_p4 = scmp.lt.s32.totalorder %s724_s22, %s507_s8 }
  0x33   : > { %p504_p13 = pnand %p502_p11, %p488_p12  ;;  %p510_p0 = scmp.lt.s32.totalorder %s508_s14, %s501_s4 }
  0x35   : > { %p505_p3 = pneg %p504_p13  ;;  %p511_p7 = por %p510_p0, %p509_p4 }
  0x37   : > { %p512_p9 = pnand %p511_p7, %p505_p3 }
  0x39   : > { %515 = shalt.err (!%p512_p9)
}
  0x3a   : > { %419 = dma.hbm_to_vmem [thread:$0]  (!%p720_p10), %s716_s23, 128, %s724_s22, %s120_s25  }
  0x3b   : > { %139 = sbr.rel (%p650_p8) target bundleno = 853 (0x355), region = 28  ;;  %p844_p6 = scmp.eq.s32.totalorder (!%p650_p8), %s631_s13, 0 }
  0x42   : > { %561 = dma.done.wait (%p844_p6), [#allocation5], 16   ;;  %p845_p12 = pmov %p844_p6 }
  0x43   : > { %s758_s19 = sand.u32 1, %s578_s10   ;;  %p846_p4 = scmp.ne.s32.totalorder %s836_s15, 0 }
  0x44   : > { %563 = vsyncadd (%p845_p12), [#allocation5], 4294967280  ;;  %s394_s21 = sshll.u32 %s758_s19, 3  ;;  %s146_s20 = scalar_lea.sflag [#allocation3], %s758_s19 }
  0x45   : > { %s149_s23 = scalar_lea.vmem [#allocation6], %s394_s21 }
  0x46   : > { %565 = dma.done.wait (%p846_p4), %s146_s20, 128  }
  0x47   : > { %567 = vsyncadd (%p846_p4), %s146_s20, 4294967168 }
  0x48   : > { %154 = sfence }
  0x49   : > { %v768_v0 = vld [vmem:[%s149_s23] sm:$0xff]  ;;  %vm172_vm0 = vcmask 523264   ;;  %s590_s17 = smov 64   ;;  %v188_v4 = vlaneseq  ;;  %s591_s15 = smov 8   ;;  %vm197_vm1 = vcmask 1047616   ;;  %vm288_vm6 = vcmask 1048064  }
  0x4a   : > { %178 = vrot.lane.b32.xlu0 %v768_v0, %s590_s17  ;;  %v173_v1 = vsel %vm172_vm0, %v768_v0, 0.0  ;;  %s592_s22 = smov 121   ;;  %s593_s24 = smov 127  }
  0x4b   : > { %174 = vadd.xlane.f32.xlu1 %v173_v1  ;;  %v189_v5 = vand.u32 127, %v188_v4  ;;  %v774_v6 = vshrl.u32 %v188_v4, 7  ;;  %s396_s25 = sld [smem:[#allocation2 + $0x1]]  ;;  %s185_s26 = sld [smem:[#allocation2]] }
  0x4c   : > { %s397_s27 = sld [smem:[#allocation2 + $0x2]]  ;;  %s401_s28 = sshll.u32 %s631_s13, 7 }
  0x4d   : > { %v194_v7 = vsub.s32 %v189_v5, %v774_v6  ;;  %v190_v22 = vmul.u32 2, %v189_v5  ;;  %v272_v51 = vsub.s32 0, %v774_v6  ;;  %s170_s29 = scalar_lea.vmem [#allocation7], %s394_s21  ;;  %s787_s7 = scalar_lea.hbm %s832_s2, %s401_s28 }
  0x4e   : > { %s304_s30 = sshll.u32 %s170_s29, 4  ;;  %s291_s13 = scalar_lea.sflag [#allocation4], %s758_s19  ;;  %s789_s30 = int_to_ptr.vmem [resolvable:$true] %s304_s30 }
  0x4f   : > { %v232_v23 = vadd.s32 1, %v190_v22  ;;  %vm204_vm3 = vcmp.ge.s32.totalorder %v190_v22, 1  ;;  %vm210_vm4 = vcmp.le.s32.totalorder %v190_v22, 14  ;;  %s516_s8 = scalar_lea.vmem %s789_s30, 128  ;;  %p847_p3 = scmp.ne.s32.totalorder %s842_s6, 0 }
  0x50   : > { %p517_p8 = scmp.ne.s32.totalorder %s789_s30, %s516_s8  ;;  %s594_s14 = smov [#allocation7]  }
  0x51   : > { %v214_v24 = vstv %s396_s25  ;;  %vm233_vm2 = vcmp.ge.s32.totalorder %v232_v23, 1  ;;  %v212_v27 = vstv %s185_s26  ;;  %vm247_vm5 = vcmp.le.s32.totalorder %v232_v23, 14  ;;  %s520_s21 = sshll.u32 %s594_s14, 4  ;;  %s521_s21 = int_to_ptr.vmem [resolvable:$false] %s520_s21 }
  0x52   : > { %v223_v33 = vstv %s397_s27  ;;  %p518_p10 = pnand %p517_p8, %p847_p3  ;;  %s522_s20 = scalar_lea.vmem %s521_s21, 256 }
  0x53   : > { %p523_p1 = scmp.lt.s32.totalorder %s789_s30, %s521_s21  ;;  %p524_p2 = scmp.lt.s32.totalorder %s522_s20, %s516_s8 }
  0x54   : > { %p519_p5 = pneg %p518_p10 }
  0x55   : > { %p525_p11 = por %p524_p2, %p523_p1 }
  0x57   : > { %p526_p13 = pnand %p525_p11, %p519_p5 }
  0xbc   : > { %v179_v2 = vpop.permute.xlu0 %178 }
  0xbd   : > { %v181_v3 = vsel %vm172_vm0, %v179_v2, 0.0 }
  0xbe   : > { %182 = vadd.xlane.f32.xlu0 %v181_v3 }
  0xd8   : > { %v175_v8 = vpop.xlane.xlu1 %174 }
  0xd9   : > { %v176_v11 = vmul.f32 0.015625, %v175_v8 }
  0xdb   : > { %v238_v13 = vrot.slane %v176_v11, %v194_v7  ;;  %v215_v25 = vmul.f32 %v214_v24, %v176_v11 }
  0xdd   : > { %v240_v28 = vsel %vm233_vm2, %v238_v13, 0.0  ;;  %v220_v30 = vrot.slane %v215_v25, %v194_v7 }
  0xde   : > { %v253_v35 = vmul.f32 %v240_v28, %v212_v27 }
 0x14b   : > { %v183_v9 = vpop.xlane.xlu0 %182 }
 0x14c   : > { %v184_v10 = vmul.f32 0.015625, %v183_v9 }
 0x14e   : > { %v195_v12 = vrot.slane %v184_v10, %v194_v7  ;;  %v254_v26 = vmul.f32 %v214_v24, %v184_v10 }
 0x150   : > { %198 = vrot.lane.b32.xlu1 %v195_v12, %s591_s15  ;;  %v211_v32 = vsel %vm210_vm4, %v195_v12, 0.0  ;;  %v259_v34 = vrot.slane %v254_v26, %v194_v7 }
 0x151   : > { %v224_v38 = vmul.f32 %v223_v33, %v211_v32 }
 0x152   : > { %v261_v41 = vadd.f32 %v259_v34, %v253_v35 }
 0x154   : > { %241 = vrot.lane.b32.xlu1 %v238_v13, %s591_s15 }
 0x1c2   : > { %v199_v14 = vpop.permute.xlu1 %198 }
 0x1c3   : > { %v200_v15 = vsel %vm197_vm1, %v199_v14, %v195_v12 }
 0x1c4   : > { %201 = vrot.lane.b32.xlu1 %v200_v15, %s591_s15 }
 0x1c6   : > { %v242_v16 = vpop.permute.xlu1 %241 }
 0x1c7   : > { %v243_v17 = vsel %vm197_vm1, %v242_v16, %v238_v13 }
 0x1c8   : > { %244 = vrot.lane.b32.xlu1 %v243_v17, %s591_s15 }
 0x236   : > { %v202_v18 = vpop.permute.xlu1 %201 }
 0x237   : > { %v203_v19 = vsel %vm197_vm1, %v202_v18, %v195_v12 }
 0x238   : > { %206 = vrot.lane.b32.xlu1 %v203_v19, %s592_s22 }
 0x23a   : > { %v245_v20 = vpop.permute.xlu1 %244 }
 0x23b   : > { %v246_v21 = vsel %vm197_vm1, %v245_v20, %v238_v13 }
 0x23c   : > { %249 = vrot.lane.b32.xlu0 %v246_v21, %s593_s24 }
 0x2aa   : > { %v207_v29 = vpop.permute.xlu1 %206 }
 0x2ab   : > { %v209_v31 = vsel %vm204_vm3, %v207_v29, 0.0 }
 0x2ac   : > { %v213_v36 = vmul.f32 %v212_v27, %v209_v31 }
 0x2ae   : > { %v222_v37 = vadd.f32 %v220_v30, %v213_v36  ;;  %v250_v39 = vpop.permute.xlu0 %249 }
 0x2af   : > { %v252_v40 = vsel %vm247_vm5, %v250_v39, 0.0 }
 0x2b0   : > { %v225_v42 = vadd.f32 %v224_v38, %v222_v37  ;;  %v262_v43 = vmul.f32 %v252_v40, %v223_v33 }
 0x2b2   : > { %v398_v44 = vmul.f32 -1.442695, %v225_v42  ;;  %v263_v45 = vadd.f32 %v262_v43, %v261_v41 }
 0x2b4   : > { %465 = vpow2.f32 %v398_v44  ;;  %v399_v46 = vmul.f32 -1.442695, %v263_v45 }
 0x2b6   : > { %467 = vpow2.f32 %v399_v46 }
 0x2be   : > { %v466_v47 = vpop.eup %465 }
 0x2bf   : > { %v229_v48 = vadd.f32 1.0, %v466_v47 }
 0x2c0   : > { %v468_v49 = vpop.eup %467 }
 0x2c1   : > { %469 = vrcp.f32 %v229_v48  ;;  %v267_v50 = vadd.f32 1.0, %v468_v49 }
 0x2c3   : > { %471 = vrcp.f32 %v267_v50 }
 0x2cb   : > { %v470_v52 = vpop.eup %469 }
 0x2cc   : > { %v273_v53 = vrot.slane %v470_v52, %v272_v51 }
 0x2cd   : > { %v472_v54 = vpop.eup %471 }
 0x2ce   : > { %275 = vbcast.lane.b32.xlu1 %v273_v53, 256  ;;  %v283_v55 = vrot.slane %v472_v54, %v272_v51 }
 0x2d2   : > { %285 = vbcast.lane.b32.xlu1 %v283_v55, 256 }
 0x340   : > { %v276_v56 = vpop.permute.xlu1 %275 }
 0x341   : > { %v277_v57 = vmul.f32 %v276_v56, %v768_v0 }
 0x343   : > { %278 = vst.msk [vmem:[%s170_s29] sm:$0xff] %vm172_vm0, %v277_v57 }
 0x344   : > { %v286_v58 = vpop.permute.xlu1 %285 }
 0x345   : > { %v287_v59 = vmul.f32 %v286_v58, %v768_v0 }
 0x347   : > { %289 = vst.msk [vmem:[%s170_s29] sm:$0xff] %vm288_vm6, %v287_v59 }
 0x348   : > { %529 = shalt.err (!%p526_p13)
}
 0x349   : > { %s530_s19 = scalar_lea.hbm %s787_s7, 128  ;;  %s534_s15 = scalar_lea.hbm %s832_s2, 512 }
 0x34a   : > { %p531_p0 = scmp.ne.s32.totalorder %s787_s7, %s530_s19  ;;  %p535_p6 = scmp.lt.u32.totalorder %s787_s7, %s832_s2 }
 0x34b   : > { %p536_p12 = scmp.lt.u32.totalorder %s534_s15, %s530_s19  ;;  %p538_p8 = scmp.lt.u32.totalorder %s530_s19, %s787_s7 }
 0x34c   : > { %p532_p7 = pnand %p531_p0, %p847_p3 }
 0x34d   : > { %p537_p4 = por %p536_p12, %p535_p6 }
 0x34e   : > { %p533_p9 = pneg %p532_p7 }
 0x34f   : > { %p539_p10 = por %p538_p8, %p537_p4 }
 0x351   : > { %p540_p5 = pnand %p539_p10, %p533_p9 }
 0x353   : > { %543 = shalt.err (!%p540_p5)
}
 0x354   : > { %410 = dma.vmem_to_hbm [thread:$0]  (%p847_p3), %s789_s30, 128, %s787_s7, %s291_s13  }
 0x355 PF: > { %p427_p1 = scmp.ge.s32.totalorder %s586_s12, 2  ;;  %s316_s25 = sand.u32 1, %s574_s9  }
 0x356   : > { %p848_p2 = scmp.ne.s32.totalorder %s837_s16, 0  ;;  %s317_s26 = scalar_lea.sflag [#allocation4], %s316_s25 }
 0x358   : > { %p421_p11 = pnand %p427_p1, %p848_p2 }
 0x35a   : > { %569 = dma.done.wait (!%p421_p11), %s317_s26, 128  }
 0x35b   : > { %571 = vsyncadd (!%p421_p11), %s317_s26, 4294967168  ;;  %p16_p13 = scmp.ge.s32.totalorder %s655_s18, 6   ;;  %s849_s9 = smov %s578_s10 }
 0x35c   : > { %s850_s10 = smov %s582_s11  ;;  %s851_s11 = smov %s695_s5 }
 0x35d   : > { %s852_s12 = smov %s655_s18  ;;  %18 = sbr.rel (!%p16_p13) target bundleno = 6 (0x6), region = 78 }
 0x364   :  { %322 = vsyncpa [#allocation3], 1 }
 0x365   :  { %324 = vsyncpa [#allocation3 + $0x1], 1 }
 0x366   :  { %325 = vsyncpa [#allocation4], 1 }
 0x367   :  { %327 = vsyncpa [#allocation4 + $0x1], 1 }
 0x368   :  { %328 = vsyncpa [#allocation5], 1 }
 0x369   :  { %330 = vsyncpa [#allocation5 + $0x1], 1 }

</bundles_post_ra>
